<compile_context>
chip_gen: v7x
topology: tpu7x:2x2x1
jax: 0.10.0
libtpu: 0.0.40
codegen_flags: <defaults>
</compile_context>

<pallas_src>
import functools

import jax
import jax.numpy as jnp
from jax import lax
from jax.experimental import pallas as pl
from jax.experimental.pallas import tpu as pltpu


def _round_up(v, m):
    return ((v + m - 1) // m) * m


# ---------------------------------------------------------------------------
# One PPNP power-iteration layer:
#     out = alpha * x0 + (1 - alpha) * dinv_row * (A @ (dinv_col * x))
# where (dinv_col * x) arrives pre-scaled and split into bf16 hi + lo parts.
# ---------------------------------------------------------------------------
def _ppnp_layer_kernel(adj_ref, hi_ref, lo_ref, dinv_ref, x0_ref, o_ref,
                       acc_ref, *, alpha, tk, x_resident):
    k = pl.program_id(1)

    if x_resident:
        # hi/lo hold the full (n_pad, c_pad) array in VMEM; slice the
        # contraction chunk for this k step (aligned, multiple of tk).
        off = pl.multiple_of(k * tk, tk)
        hi = hi_ref[pl.ds(off, tk), :]
        lo = lo_ref[pl.ds(off, tk), :]
    else:
        hi = hi_ref[...]
        lo = lo_ref[...]

    adj = adj_ref[...]  # bf16 tile, edge counts exact (< 256)
    part = (jnp.dot(adj, hi, preferred_element_type=jnp.float32)
            + jnp.dot(adj, lo, preferred_element_type=jnp.float32))

    @pl.when(k == 0)
    def _():
        acc_ref[...] = part            # direct assign: no zero-init pass

    @pl.when(k != 0)
    def _():
        acc_ref[...] += part

    @pl.when(k == pl.num_programs(1) - 1)
    def _():
        o_ref[...] = (alpha * x0_ref[...]
                      + (1.0 - alpha) * dinv_ref[...] * acc_ref[...]
                      ).astype(o_ref.dtype)


# ---------------------------------------------------------------------------
# Generation-aware tiling / VMEM plan.
# ---------------------------------------------------------------------------
def _plan(n, c_pad):
    try:
        info = pltpu.get_tpu_info()
        vmem_cap = int(getattr(info, "vmem_capacity_bytes", 64 * 1024 * 1024))
    except Exception:  # pragma: no cover - fallback if query unavailable
        vmem_cap = 64 * 1024 * 1024
    budget = (vmem_cap * 3) // 4       # per-TensorCore headroom

    n128 = _round_up(max(n, 1), 128)
    tile = 128
    for t in (256, 512, 1024, 2048):
        extra_pad = _round_up(n, t) - n128
        adj_bytes = 2 * t * t * 2                      # double-buffered bf16
        small = 5 * t * c_pad * 4                      # x0(2) + out(2) + acc
        if extra_pad <= n128 // 8 and adj_bytes + small <= budget // 2:
            tile = t
    n_pad = _round_up(n, tile)

    adj_bytes = 2 * tile * tile * 2
    small = 5 * tile * c_pad * 4 + 2 * tile * 4 * 2
    resident_bytes = 2 * 2 * n_pad * c_pad * 2         # hi+lo, 2 bufs, bf16
    x_resident = adj_bytes + small + resident_bytes <= budget
    if not x_resident:
        resident_bytes = 2 * 2 * tile * c_pad * 2      # streamed per k step
    vmem_limit = min(max(adj_bytes + small + resident_bytes + (8 << 20),
                         32 << 20), budget)
    return tile, n_pad, x_resident, int(vmem_limit)


@functools.partial(jax.jit, static_argnames=("alpha", "num_layers"))
def ppnp1_forward(x, edge_index, *, alpha=0.1, num_layers=1):
    """Replicates PPNP1.forward(x, edge_index).

    x:          (N, C) float node features
    edge_index: (2, E) int32 edge list (src row, dst row)
    """
    n, c = x.shape

    # ---- glue (plain XLA): add_self_loops + dense adjacency scatter ----
    # TODO(synk): for very large sparse graphs a CSR gather/segment-sum kernel
    # via PrefetchScalarGridSpec would avoid materializing the dense N x N adj.
    loops = jnp.stack([jnp.arange(n, dtype=edge_index.dtype)] * 2, axis=0)
    ei = jnp.concatenate([edge_index, loops], axis=1)

    c_pad = _round_up(c, 128)
    tile, n_pad, x_resident, vmem_limit = _plan(n, c_pad)

    # Build adjacency directly at padded size in bf16 (single N^2 pass).
    adj_p = jnp.zeros((n_pad, n_pad), jnp.bfloat16).at[ei[0], ei[1]].add(1.0)

    # O(E) degrees -> D^{-1/2}.  Real nodes always have a self loop so
    # deg >= 1; padded rows get dinv = 0 and therefore stay exactly zero.
    deg = jnp.zeros((n,), jnp.float32).at[ei[0]].add(1.0)
    dinv = lax.rsqrt(deg)
    dinv_p = jnp.zeros((n_pad, 1), jnp.float32).at[:n, 0].set(dinv)

    x_p = jnp.zeros((n_pad, c_pad), jnp.float32).at[:n, :c].set(
        x.astype(jnp.float32))

    if x_resident:
        # Whole scaled-feature matrix stays in VMEM (DMA'd once per layer).
        x_spec = pl.BlockSpec((n_pad, c_pad), lambda i, k: (0, 0))
    else:
        x_spec = pl.BlockSpec((tile, c_pad), lambda i, k: (k, 0))

    grid = (n_pad // tile, n_pad // tile)
    layer = pl.pallas_call(
        functools.partial(_ppnp_layer_kernel, alpha=float(alpha), tk=tile,
                          x_resident=x_resident),
        out_shape=jax.ShapeDtypeStruct((n_pad, c_pad), jnp.float32),
        grid=grid,
        in_specs=[
            pl.BlockSpec((tile, tile), lambda i, k: (i, k)),   # adj (streamed)
            x_spec,                                            # hi(dinv * x)
            x_spec,                                            # lo(dinv * x)
            pl.BlockSpec((tile, 1), lambda i, k: (i, 0)),      # dinv rows
            pl.BlockSpec((tile, c_pad), lambda i, k: (i, 0)),  # x0
        ],
        out_specs=pl.BlockSpec((tile, c_pad), lambda i, k: (i, 0)),
        scratch_shapes=[pltpu.VMEM((tile, c_pad), jnp.float32)],
        compiler_params=pltpu.CompilerParams(
            dimension_semantics=("parallel", "arbitrary"),     # megacore rows
            vmem_limit_bytes=vmem_limit,
        ),
    )

    x_cur = x_p
    for _ in range(int(num_layers)):
        # Pre-scale once per layer (O(N*C)), split into bf16 hi/lo so the
        # kernel runs native bf16 MXU passes at ~f32 accuracy.
        xs = dinv_p * x_cur
        hi = xs.astype(jnp.bfloat16)
        lo = (xs - hi.astype(jnp.float32)).astype(jnp.bfloat16)
        x_cur = layer(adj_p, hi, lo, dinv_p, x_p)

    return x_cur[:n, :c].astype(x.dtype)


def _reference(x, edge_index, alpha=0.1, num_layers=1):
    """Pure-JAX reference mirroring the PyTorch code (full f32 precision)."""
    n = x.shape[0]
    hp = lax.Precision.HIGHEST
    loops = jnp.stack([jnp.arange(n, dtype=edge_index.dtype)] * 2, axis=0)
    ei = jnp.concatenate([edge_index, loops], axis=1)
    adj = jnp.zeros((n, n), jnp.float32).at[ei[0], ei[1]].add(1.0)
    deg = jnp.diag(jnp.power(adj.sum(axis=1), -0.5))
    norm_adj = jnp.matmul(jnp.matmul(deg, adj, precision=hp), deg,
                          precision=hp)
    x0 = x
    for _ in range(num_layers):
        x = alpha * x0 + (1 - alpha) * jnp.matmul(norm_adj, x, precision=hp)
    return x


if __name__ == "__main__":
    key = jax.random.PRNGKey(0)

    N = 16             # number of graph nodes
    IN_CHANNELS = 32   # feature width
    OUT_CHANNELS = 16  # fc output width (fc is defined in __init__ but unused)
    ALPHA = 0.1
    NUM_LAYERS = 2

    k_x, k_w, k_b = jax.random.split(key, 3)
    x = jax.random.normal(k_x, (N, IN_CHANNELS), dtype=jnp.float32)

    # TODO(synk): self.fc (Linear(in, out)) is never applied in PPNP1.forward,
    # so it does not enter the kernel; parameters below are unused by design.
    fc_weight = jax.random.normal(k_w, (OUT_CHANNELS, IN_CHANNELS),
                                  jnp.float32) * 0.02
    fc_bias = jax.random.normal(k_b, (OUT_CHANNELS,), jnp.float32) * 0.02
    del fc_weight, fc_bias

    # Deterministic ring graph (bidirectional), no pre-existing self loops.
    src = jnp.arange(N, dtype=jnp.int32)
    dst = (src + 1) % N
    edge_index = jnp.concatenate(
        [jnp.stack([src, dst], axis=0), jnp.stack([dst, src], axis=0)], axis=1
    )  # (2, 2N)

    out = ppnp1_forward(x, edge_index, alpha=ALPHA, num_layers=NUM_LAYERS)
    out = jax.block_until_ready(out)

    ref = _reference(x, edge_index, alpha=ALPHA, num_layers=NUM_LAYERS)
    assert out.shape == (N, IN_CHANNELS)
    assert jnp.allclose(out, ref, atol=1e-4, rtol=1e-4), "mismatch vs reference"

    print("KERNEL_OK")
</pallas_src>

<mosaic_0001>
module attributes {stable_mosaic.version = 11 : i64} {
  func.func private @main(%arg0: i32) attributes {dimension_semantics = [#tpu.dimension_semantics<core_parallel>], iteration_bounds = array<i64: 2>, tpu.core_type = #tpu.core_type<sc_scalar_subcore>, window_params = []} {
    return
  }
}

module attributes {stable_mosaic.version = 11 : i64} {
  func.func private @main(%arg0: i32) attributes {dimension_semantics = [#tpu.dimension_semantics<core_parallel>], iteration_bounds = array<i64: 2>, tpu.core_type = #tpu.core_type<sc_scalar_subcore>, window_params = []} {
    return
  }
}

module attributes {stable_mosaic.version = 11 : i64} {
  func.func @_ppnp_layer_kernel(%arg0: i32, %arg1: i32, %arg2: memref<128x128xbf16, #tpu.memory_space<vmem>>, %arg3: memref<128x128xbf16, #tpu.memory_space<vmem>>, %arg4: memref<128x128xbf16, #tpu.memory_space<vmem>>, %arg5: memref<128x1xf32, #tpu.memory_space<vmem>>, %arg6: memref<128x128xf32, #tpu.memory_space<vmem>>, %arg7: memref<128x128xf32, #tpu.memory_space<vmem>>, %arg8: memref<128x128xf32, #tpu.memory_space<vmem>>) attributes {dimension_semantics = [#tpu.dimension_semantics<parallel>, #tpu.dimension_semantics<arbitrary>], iteration_bounds = array<i64: 1, 1>, scalar_prefetch = 0 : i64, scratch_operands = 1 : i64, tpu.core_type = #tpu.core_type<tc>, window_params = [{transform_indices = @transform_0, window_bounds = array<i64: 128, 128>}, {pipeline_mode = #tpu.pipeline_mode<synchronous>, transform_indices = @transform_1, window_bounds = array<i64: 128, 128>}, {pipeline_mode = #tpu.pipeline_mode<synchronous>, transform_indices = @transform_2, window_bounds = array<i64: 128, 128>}, {transform_indices = @transform_3, window_bounds = array<i64: 128, 1>}, {transform_indices = @transform_4, window_bounds = array<i64: 128, 128>}, {transform_indices = @transform_5, window_bounds = array<i64: 128, 128>}]} {
    %c128_i32 = arith.constant 128 : i32
    %0 = arith.muli %arg1, %c128_i32 : i32
    %1 = tpu.assume_multiple %0, 128 : i32
    %2 = arith.index_cast %1 : i32 to index
    %c0 = arith.constant 0 : index
    %3 = vector.load %arg3[%2, %c0] : memref<128x128xbf16, #tpu.memory_space<vmem>>, vector<128x128xbf16>
    %4 = arith.index_cast %1 : i32 to index
    %c0_0 = arith.constant 0 : index
    %5 = vector.load %arg4[%4, %c0_0] : memref<128x128xbf16, #tpu.memory_space<vmem>>, vector<128x128xbf16>
    %c0_1 = arith.constant 0 : index
    %c0_2 = arith.constant 0 : index
    %6 = vector.load %arg2[%c0_1, %c0_2] : memref<128x128xbf16, #tpu.memory_space<vmem>>, vector<128x128xbf16>
    %cst = arith.constant dense<0.000000e+00> : vector<128x128xf32>
    %7 = tpu.matmul %6, %3, %cst {dimension_numbers = #tpu.dot_dimension_numbers<[1], [0], [0], [1], [0, 0, 1, 1], [], []>} : vector<128x128xbf16>, vector<128x128xbf16>, vector<128x128xf32> -> vector<128x128xf32>
    %cst_3 = arith.constant dense<0.000000e+00> : vector<128x128xf32>
    %8 = tpu.matmul %6, %5, %cst_3 {dimension_numbers = #tpu.dot_dimension_numbers<[1], [0], [0], [1], [0, 0, 1, 1], [], []>} : vector<128x128xbf16>, vector<128x128xbf16>, vector<128x128xf32> -> vector<128x128xf32>
    %9 = arith.addf %7, %8 : vector<128x128xf32>
    %c0_i32 = arith.constant 0 : i32
    %10 = arith.cmpi eq, %arg1, %c0_i32 : i32
    %11 = arith.extui %10 : i1 to i32
    %c0_i32_4 = arith.constant 0 : i32
    %12 = arith.cmpi ne, %11, %c0_i32_4 : i32
    scf.if %12 {
      %c0_9 = arith.constant 0 : index
      %c0_10 = arith.constant 0 : index
      %19 = vector.load %arg8[%c0_9, %c0_10] : memref<128x128xf32, #tpu.memory_space<vmem>>, vector<128x128xf32>
      tpu.vector_store %arg8[%c0_9, %c0_10], %9 {strides = array<i32>} : memref<128x128xf32, #tpu.memory_space<vmem>>, vector<128x128xf32>,
    } else {
    }
    %c0_i32_5 = arith.constant 0 : i32
    %13 = arith.cmpi ne, %arg1, %c0_i32_5 : i32
    %14 = arith.extui %13 : i1 to i32
    %c0_i32_6 = arith.constant 0 : i32
    %15 = arith.cmpi ne, %14, %c0_i32_6 : i32
    scf.if %15 {
      %c0_9 = arith.constant 0 : index
      %c0_10 = arith.constant 0 : index
      %19 = vector.load %arg8[%c0_9, %c0_10] : memref<128x128xf32, #tpu.memory_space<vmem>>, vector<128x128xf32>
      %20 = arith.addf %19, %9 : vector<128x128xf32>
      %c0_11 = arith.constant 0 : index
      %c0_12 = arith.constant 0 : index
      %21 = vector.load %arg8[%c0_11, %c0_12] : memref<128x128xf32, #tpu.memory_space<vmem>>, vector<128x128xf32>
      tpu.vector_store %arg8[%c0_11, %c0_12], %20 {strides = array<i32>} : memref<128x128xf32, #tpu.memory_space<vmem>>, vector<128x128xf32>,
    } else {
    }
    %c0_i32_7 = arith.constant 0 : i32
    %16 = arith.cmpi eq, %arg1, %c0_i32_7 : i32
    %17 = arith.extui %16 : i1 to i32
    %c0_i32_8 = arith.constant 0 : i32
    %18 = arith.cmpi ne, %17, %c0_i32_8 : i32
    scf.if %18 {
      %c0_9 = arith.constant 0 : index
      %c0_10 = arith.constant 0 : index
      %19 = vector.load %arg6[%c0_9, %c0_10] : memref<128x128xf32, #tpu.memory_space<vmem>>, vector<128x128xf32>
      %cst_11 = arith.constant 1.000000e-01 : f32
      %20 = vector.broadcast %cst_11 : f32 to vector<128x128xf32>
      %21 = arith.mulf %20, %19 : vector<128x128xf32>
      %c0_12 = arith.constant 0 : index
      %c0_13 = arith.constant 0 : index
      %22 = vector.load %arg5[%c0_12, %c0_13] : memref<128x1xf32, #tpu.memory_space<vmem>>, vector<128x1xf32>
      %cst_14 = arith.constant 0.899999976 : f32
      %23 = vector.broadcast %cst_14 : f32 to vector<128x1xf32>
      %24 = arith.mulf %23, %22 : vector<128x1xf32>
      %c0_15 = arith.constant 0 : index
      %c0_16 = arith.constant 0 : index
      %25 = vector.load %arg8[%c0_15, %c0_16] : memref<128x128xf32, #tpu.memory_space<vmem>>, vector<128x128xf32>
      %26 = vector.broadcast %24 : vector<128x1xf32> to vector<128x128xf32>
      %27 = arith.mulf %26, %25 : vector<128x128xf32>
      %28 = arith.addf %21, %27 : vector<128x128xf32>
      %c0_17 = arith.constant 0 : index
      %c0_18 = arith.constant 0 : index
      %29 = vector.load %arg7[%c0_17, %c0_18] : memref<128x128xf32, #tpu.memory_space<vmem>>, vector<128x128xf32>
      tpu.vector_store %arg7[%c0_17, %c0_18], %28 {strides = array<i32>} : memref<128x128xf32, #tpu.memory_space<vmem>>, vector<128x128xf32>,
    } else {
    }
    return
  }
  func.func @transform_0(%arg0: i32, %arg1: i32) -> (i32, i32) {
    %c0_i32 = arith.constant 0 : i32
    return %arg0, %arg1 : i32, i32
  }
  func.func @transform_1(%arg0: i32, %arg1: i32) -> (i32, i32) {
    %c0_i32 = arith.constant 0 : i32
    %c0_i32_0 = arith.constant 0 : i32
    %c0_i32_1 = arith.constant 0 : i32
    return %c0_i32, %c0_i32_0 : i32, i32
  }
  func.func @transform_2(%arg0: i32, %arg1: i32) -> (i32, i32) {
    %c0_i32 = arith.constant 0 : i32
    %c0_i32_0 = arith.constant 0 : i32
    %c0_i32_1 = arith.constant 0 : i32
    return %c0_i32, %c0_i32_0 : i32, i32
  }
  func.func @transform_3(%arg0: i32, %arg1: i32) -> (i32, i32) {
    %c0_i32 = arith.constant 0 : i32
    %c0_i32_0 = arith.constant 0 : i32
    return %arg0, %c0_i32 : i32, i32
  }
  func.func @transform_4(%arg0: i32, %arg1: i32) -> (i32, i32) {
    %c0_i32 = arith.constant 0 : i32
    %c0_i32_0 = arith.constant 0 : i32
    return %arg0, %c0_i32 : i32, i32
  }
  func.func @transform_5(%arg0: i32, %arg1: i32) -> (i32, i32) {
    %c0_i32 = arith.constant 0 : i32
    %c0_i32_0 = arith.constant 0 : i32
    return %arg0, %c0_i32 : i32, i32
  }
}

</mosaic_0001>

<bundles_post_ra>
// kernel: ppnp1_forward.2
= control target key start
LH: loop header
LB: loop body
LE: loop exit
PB: predicated region body
PF: predicated region fallthrough
CT: control target
= control target key end

     0   :  { %v868_v1 = vmov 0   ;;  %s1124_s2 = inlined_call_operand.vmem [shape: bf16[128,128], index: 2, kind: input, shape index: {}]   ;;  %s1125_s1 = inlined_call_operand.vmem [shape: bf16[128,128], index: 1, kind: input, shape index: {}]   ;;  %s1126_s0 = inlined_call_operand.vmem [shape: bf16[128,128], index: 0, kind: input, shape index: {}]   ;;  %s1127_s3 = inlined_call_operand.vmem [shape: f32[128,1], index: 3, kind: input, shape index: {}]   ;;  %s1128_s4 = inlined_call_operand.vmem [shape: f32[128,128], index: 4, kind: input, shape index: {}]   ;;  %s1129_s5 = inlined_call_operand.vmem [shape: f32[128,128], index: 5, kind: output, shape index: {}]  }
   0x1   :  { %v844_v0 = vld [vmem:[%s1124_s2] sm:$0xff]   ;;  %843 = vset.pattern.permute.xlu1 %v868_v1  ;;  %842 = vset.pattern.permute.xlu0 %v868_v1  ;;  %v846_v3 = vld [vmem:[%s1124_s2 + $0x8] sm:$0xff]   ;;  %v848_v5 = vld [vmem:[%s1124_s2 + $0x10] sm:$0xff]  }
   0x2   :  { %v845_v2 = vld [vmem:[%s1125_s1] sm:$0xff]   ;;  %761 = vmatprep.subr.bf16.mxu1 %v844_v0  ;;  %v847_v4 = vld [vmem:[%s1125_s1 + $0x8] sm:$0xff]   ;;  %v849_v6 = vld [vmem:[%s1125_s1 + $0x10] sm:$0xff]  }
   0x3   :  { %793 = vmatprep.subr.bf16.mxu0 %v845_v2  ;;  %762 = vmatpush3.bf16.msra.mxu1 %v844_v0  ;;  %v850_v7 = vld [vmem:[%s1124_s2 + $0x18] sm:$0xff]   ;;  %v852_v9 = vld [vmem:[%s1124_s2 + $0x20] sm:$0xff]   ;;  %v854_v11 = vld [vmem:[%s1124_s2 + $0x28] sm:$0xff]  }
   0x4   :  { %794 = vmatpush3.bf16.msra.mxu0 %v845_v2  ;;  %763 = vmatprep.subr.bf16.mxu1 %v846_v3  ;;  %v851_v8 = vld [vmem:[%s1125_s1 + $0x18] sm:$0xff]   ;;  %v853_v10 = vld [vmem:[%s1125_s1 + $0x20] sm:$0xff]   ;;  %v855_v13 = vld [vmem:[%s1125_s1 + $0x28] sm:$0xff]  }
   0x5   :  { %795 = vmatprep.subr.bf16.mxu0 %v847_v4  ;;  %v860_v12 = vld [vmem:[%s1126_s0] sm:$0xff]   ;;  %v856_v14 = vld [vmem:[%s1124_s2 + $0x30] sm:$0xff]   ;;  %v858_v16 = vld [vmem:[%s1124_s2 + $0x38] sm:$0xff]  }
   0x6   :  { %777 = vmatprep.mubr.bf16.mxu1 %v860_v12  ;;  %809 = vmatprep.mubr.bf16.mxu0 %v860_v12  ;;  %v857_v15 = vld [vmem:[%s1125_s1 + $0x30] sm:$0xff]   ;;  %v521_v18 = vld [vmem:[%s1127_s3] sm:$0xff]  ;;  %v524_v19 = vld [vmem:[%s1127_s3 + $0x18] sm:$0xff] }
   0x7   :  { %764 = vmatpush3.bf16.msra.mxu1 %v846_v3  ;;  %v523_v17 = vld [vmem:[%s1127_s3 + $0x10] sm:$0xff]  ;;  %v859_v20 = vld [vmem:[%s1125_s1 + $0x38] sm:$0xff]   ;;  %v537_v22 = vmul.f32 0.9, %v521_v18  ;;  %v522_v23 = vld [vmem:[%s1127_s3 + $0x8] sm:$0xff] }
   0x8   :  { %796 = vmatpush3.bf16.msra.mxu0 %v847_v4  ;;  %765 = vmatprep.subr.bf16.mxu1 %v848_v5  ;;  %v539_v21 = vmul.f32 0.9, %v523_v17  ;;  %v540_v24 = vmul.f32 0.9, %v524_v19  ;;  %v538_v25 = vmul.f32 0.9, %v522_v23 }
   0x9   :  { %797 = vmatprep.subr.bf16.mxu0 %v849_v6  ;;  %571 = vperm.xlu0 %842, %v537_v22   ;;  %v526_v26 = vld [vmem:[%s1127_s3 + $0x28] sm:$0xff]  ;;  %v525_v28 = vld [vmem:[%s1127_s3 + $0x20] sm:$0xff]  ;;  %v862_v29 = vld [vmem:[%s1126_s0 + $0x10] sm:$0xff]  }
   0xa   :  { %581 = vperm.xlu1 %843, %v539_v21   ;;  %v861_v27 = vld [vmem:[%s1126_s0 + $0x8] sm:$0xff]   ;;  %v542_v30 = vmul.f32 0.9, %v526_v26  ;;  %v541_v31 = vmul.f32 0.9, %v525_v28  ;;  %v528_v32 = vld [vmem:[%s1127_s3 + $0x38] sm:$0xff] }
   0xb   :  { %766 = vmatpush3.bf16.msra.mxu1 %v848_v5  ;;  %v527_v33 = vld [vmem:[%s1127_s3 + $0x30] sm:$0xff]  ;;  %v544_v34 = vmul.f32 0.9, %v528_v32  ;;  %v530_v36 = vld [vmem:[%s1127_s3 + $0x48] sm:$0xff]  ;;  %v863_v37 = vld [vmem:[%s1126_s0 + $0x18] sm:$0xff]  }
   0xc   :  { %798 = vmatpush3.bf16.msra.mxu0 %v849_v6  ;;  %767 = vmatprep.subr.bf16.mxu1 %v850_v7  ;;  %v543_v35 = vmul.f32 0.9, %v527_v33  ;;  %v529_v38 = vld [vmem:[%s1127_s3 + $0x40] sm:$0xff]  ;;  %v546_v40 = vmul.f32 0.9, %v530_v36  ;;  %v532_v42 = vld [vmem:[%s1127_s3 + $0x58] sm:$0xff] }
   0xd   :  { %799 = vmatprep.subr.bf16.mxu0 %v851_v8  ;;  %576 = vperm.xlu0 %842, %v538_v25   ;;  %v864_v39 = vld [vmem:[%s1126_s0 + $0x20] sm:$0xff]   ;;  %v545_v41 = vmul.f32 0.9, %v529_v38  ;;  %v531_v43 = vld [vmem:[%s1127_s3 + $0x50] sm:$0xff]  ;;  %v548_v44 = vmul.f32 0.9, %v532_v42 }
   0xe   :  { %586 = vperm.xlu1 %843, %v540_v24   ;;  %v547_v45 = vmul.f32 0.9, %v531_v43  ;;  %v534_v46 = vld [vmem:[%s1127_s3 + $0x68] sm:$0xff]  ;;  %v533_v48 = vld [vmem:[%s1127_s3 + $0x60] sm:$0xff]  ;;  %v866_v49 = vld [vmem:[%s1126_s0 + $0x30] sm:$0xff]  }
   0xf   :  { %768 = vmatpush3.bf16.msra.mxu1 %v850_v7  ;;  %v865_v47 = vld [vmem:[%s1126_s0 + $0x28] sm:$0xff]   ;;  %v550_v50 = vmul.f32 0.9, %v534_v46  ;;  %v549_v51 = vmul.f32 0.9, %v533_v48  ;;  %v536_v52 = vld [vmem:[%s1127_s3 + $0x78] sm:$0xff] }
  0x10   :  { %800 = vmatpush3.bf16.msra.mxu0 %v851_v8  ;;  %769 = vmatprep.subr.bf16.mxu1 %v852_v9  ;;  %v535_v53 = vld [vmem:[%s1127_s3 + $0x70] sm:$0xff]  ;;  %v552_v54 = vmul.f32 0.9, %v536_v52  ;;  %v867_v56 = vld [vmem:[%s1126_s0 + $0x38] sm:$0xff]   ;;  %v489_v4 = vld [vmem:[%s1128_s4] sm:$0xff] }
  0x11   :  { %801 = vmatprep.subr.bf16.mxu0 %v853_v10  ;;  %591 = vperm.xlu0 %842, %v541_v31   ;;  %v551_v55 = vmul.f32 0.9, %v535_v53  ;;  %v491_v1 = vld [vmem:[%s1128_s4 + $0x10] sm:$0xff]  ;;  %v492_v7 = vld [vmem:[%s1128_s4 + $0x18] sm:$0xff]  ;;  %v490_v12 = vld [vmem:[%s1128_s4 + $0x8] sm:$0xff] }
  0x12   :  { %596 = vperm.xlu1 %843, %v542_v30   ;;  %v508_v19 = vmul.f32 0.1, %v492_v7  ;;  %v506_v23 = vmul.f32 0.1, %v490_v12  ;;  %v493_v33 = vld [vmem:[%s1128_s4 + $0x20] sm:$0xff]  ;;  %v494_v42 = vld [vmem:[%s1128_s4 + $0x28] sm:$0xff] }
  0x13   :  { %770 = vmatpush3.bf16.msra.mxu1 %v852_v9  ;;  %v507_v9 = vmul.f32 0.1, %v491_v1  ;;  %v510_v53 = vmul.f32 0.1, %v494_v42 }
  0x14   :  { %802 = vmatpush3.bf16.msra.mxu0 %v853_v10  ;;  %771 = vmatprep.subr.bf16.mxu1 %v854_v11 }
  0x15   :  { %803 = vmatprep.subr.bf16.mxu0 %v855_v13  ;;  %601 = vperm.xlu0 %842, %v543_v35  }
  0x16   :  { %606 = vperm.xlu1 %843, %v544_v34  }
  0x17   :  { %772 = vmatpush3.bf16.msra.mxu1 %v854_v11 }
  0x18   :  { %804 = vmatpush3.bf16.msra.mxu0 %v855_v13  ;;  %773 = vmatprep.subr.bf16.mxu1 %v856_v14 }
  0x19   :  { %805 = vmatprep.subr.bf16.mxu0 %v857_v15  ;;  %611 = vperm.xlu0 %842, %v545_v41  }
  0x1a   :  { %616 = vperm.xlu1 %843, %v546_v40  }
  0x1b   :  { %774 = vmatpush3.bf16.msra.mxu1 %v856_v14  ;;  %v505_v14 = vmul.f32 0.1, %v489_v4  ;;  %v500_v4 = vld [vmem:[%s1128_s4 + $0x58] sm:$0xff] }
  0x1c   :  { %806 = vmatpush3.bf16.msra.mxu0 %v857_v15  ;;  %775 = vmatprep.subr.bf16.mxu1 %v858_v16 }
  0x1d   :  { %807 = vmatprep.subr.bf16.mxu0 %v859_v20  ;;  %621 = vperm.xlu0 %842, %v547_v45  }
  0x1e   :  { %626 = vperm.xlu1 %843, %v548_v44   ;;  %v509_v44 = vmul.f32 0.1, %v493_v33  ;;  %v504_v33 = vld [vmem:[%s1128_s4 + $0x78] sm:$0xff] }
  0x1f   :  { %776 = vmatpush3.bf16.msra.mxu1 %v858_v16 }
  0x20   :  { %808 = vmatpush3.bf16.msra.mxu0 %v859_v20 }
  0x21   :  { %631 = vperm.xlu0 %842, %v549_v51  }
  0x22   :  { %778 = vmatmul.mubr.bf16.vlgmr.msra.gmra.mrb[0].mxu1 %v861_v27  ;;  %636 = vperm.xlu1 %843, %v550_v50  }
  0x23   :  { %810 = vmatmul.mubr.bf16.vlgmr.msra.gmra.mrb[0].mxu0 %v861_v27  ;;  %781 = vmatprep.mubr.bf16.mxu1 %v862_v29 }
  0x24   :  { %813 = vmatprep.mubr.bf16.mxu0 %v862_v29  ;;  %v495_v29 = vld [vmem:[%s1128_s4 + $0x30] sm:$0xff] }
  0x25   :  { %641 = vperm.xlu0 %842, %v551_v55  }
  0x26   :  { %646 = vperm.xlu1 %843, %v552_v54  }
  0x2a   :  { %782 = vmatmul.mubr.bf16.gmra.mrb[4].mxu1 %v863_v37 }
  0x2b   :  { %814 = vmatmul.mubr.bf16.gmra.mrb[4].mxu0 %v863_v37  ;;  %785 = vmatprep.mubr.bf16.mxu1 %v864_v39  ;;  %v496_v37 = vld [vmem:[%s1128_s4 + $0x38] sm:$0xff] }
  0x2c   :  { %817 = vmatprep.mubr.bf16.mxu0 %v864_v39  ;;  %v511_v39 = vmul.f32 0.1, %v495_v29 }
  0x32   :  { %786 = vmatmul.mubr.bf16.gmra.mrb[8].mxu1 %v865_v47 }
  0x33   :  { %818 = vmatmul.mubr.bf16.gmra.mrb[8].mxu0 %v865_v47  ;;  %789 = vmatprep.mubr.bf16.mxu1 %v866_v49 }
  0x34   :  { %821 = vmatprep.mubr.bf16.mxu0 %v866_v49  ;;  %v512_v49 = vmul.f32 0.1, %v496_v37 }
  0x3a   :  { %790 = vmatmul.mubr.bf16.gmra.mrb[12].mxu1 %v867_v56 }
  0x3b   :  { %822 = vmatmul.mubr.bf16.gmra.mrb[12].mxu0 %v867_v56 }
  0x88   :  { %v572_v57 = vpop.permute.xlu0 %571 }
  0x89   :  { %v582_v58 = vpop.permute.xlu1 %581 }
  0x8c   :  { %v577_v59 = vpop.permute.xlu0 %576 }
  0x8d   :  { %v587_v60 = vpop.permute.xlu1 %586 }
  0x90   :  { %v592_v61 = vpop.permute.xlu0 %591 }
  0x91   :  { %v1019_v62 = vpop.permute.xlu1 %596 }
  0x94   :  { %v602_v63 = vpop.permute.xlu0 %601 }
  0x95   :  { %v607_v0 = vpop.permute.xlu1 %606 }
  0x98   :  { %v1024_v2 = vpop.permute.xlu0 %611 }
  0x99   :  { %v1035_v26 = vpop.permute.xlu1 %616 }
  0x9c   :  { %v622_v30 = vpop.permute.xlu0 %621 }
  0x9d   :  { %v627_v56 = vpop.permute.xlu1 %626 }
  0xf5   :  { %v779_v3 = vpop.f32.mrb[0].mxu1 }
  0xf6   :  { %v811_v5 = vpop.f32.mrb[0].mxu0  ;;  %v206_v6 = vpop.f32.mrb[1].mxu1 }
  0xf7   :  { %v360_v8 = vadd.f32 %v811_v5, %v779_v3  ;;  %v351_v10 = vpop.f32.mrb[1].mxu0  ;;  %v780_v11 = vpop.f32.mrb[2].mxu1 }
  0xf8   :  { %v352_v13 = vadd.f32 %v351_v10, %v206_v6  ;;  %v812_v15 = vpop.f32.mrb[2].mxu0  ;;  %v209_v16 = vpop.f32.mrb[3].mxu1 }
  0xf9   :  { %v651_v17 = vmul.f32 %v582_v58, %v360_v8  ;;  %v363_v18 = vadd.f32 %v812_v15, %v780_v11  ;;  %v354_v20 = vpop.f32.mrb[3].mxu0 }
  0xfa   :  { %v649_v21 = vmul.f32 %v572_v57, %v352_v13  ;;  %v355_v22 = vadd.f32 %v354_v20, %v209_v16  ;;  %v516_v16 = vmul.f32 0.1, %v500_v4 }
  0xfb   :  { %v667_v24 = vadd.f32 %v651_v17, %v507_v9  ;;  %v652_v25 = vmul.f32 %v587_v60, %v363_v18  ;;  %v632_v60 = vpop.permute.xlu0 %631  ;;  %v498_v9 = vld [vmem:[%s1128_s4 + $0x48] sm:$0xff] }
  0xfc   :  { %v665_v27 = vadd.f32 %v649_v21, %v505_v14  ;;  %v650_v28 = vmul.f32 %v577_v59, %v355_v22  ;;  %v499_v59 = vld [vmem:[%s1128_s4 + $0x50] sm:$0xff]  ;;  %v514_v20 = vmul.f32 0.1, %v498_v9 }
  0xfd   :  { %683 = vst [vmem:[%s1129_s5 + $0x10] sm:$0xff] %v667_v24  ;;  %v668_v31 = vadd.f32 %v652_v25, %v508_v19  ;;  %v783_v32 = vpop.f32.mrb[4].mxu1  ;;  %v515_v6 = vmul.f32 0.1, %v499_v59 }
  0xfe   :  { %681 = vst [vmem:[%s1129_s5] sm:$0xff] %v665_v27  ;;  %v666_v34 = vadd.f32 %v650_v28, %v506_v23  ;;  %v815_v35 = vpop.f32.mrb[4].mxu0  ;;  %v222_v36 = vpop.f32.mrb[5].mxu1  ;;  %v503_v27 = vld [vmem:[%s1128_s4 + $0x70] sm:$0xff] }
  0xff   :  { %684 = vst [vmem:[%s1129_s5 + $0x18] sm:$0xff] %v668_v31  ;;  %v376_v38 = vadd.f32 %v815_v35, %v783_v32  ;;  %v367_v40 = vpop.f32.mrb[5].mxu0  ;;  %v784_v41 = vpop.f32.mrb[6].mxu1  ;;  %v519_v35 = vmul.f32 0.1, %v503_v27 }
 0x100   :  { %682 = vst [vmem:[%s1129_s5 + $0x8] sm:$0xff] %v666_v34  ;;  %v368_v43 = vadd.f32 %v367_v40, %v222_v36  ;;  %v816_v45 = vpop.f32.mrb[6].mxu0  ;;  %v225_v46 = vpop.f32.mrb[7].mxu1 }
 0x101   :  { %v655_v47 = vmul.f32 %v602_v63, %v376_v38  ;;  %v379_v48 = vadd.f32 %v816_v45, %v784_v41  ;;  %v370_v50 = vpop.f32.mrb[7].mxu0  ;;  %v637_v23 = vpop.permute.xlu1 %636  ;;  %v502_v38 = vld [vmem:[%s1128_s4 + $0x68] sm:$0xff]  ;;  %v520_v45 = vmul.f32 0.1, %v504_v33 }
 0x102   :  { %v653_v51 = vmul.f32 %v592_v61, %v368_v43  ;;  %v371_v52 = vadd.f32 %v370_v50, %v225_v46  ;;  %v497_v61 = vld [vmem:[%s1128_s4 + $0x40] sm:$0xff]  ;;  %v642_v28 = vpop.permute.xlu0 %641  ;;  %v518_v50 = vmul.f32 0.1, %v502_v38 }
 0x103   :  { %v671_v54 = vadd.f32 %v655_v47, %v511_v39  ;;  %v656_v55 = vmul.f32 %v607_v0, %v379_v48  ;;  %v513_v11 = vmul.f32 0.1, %v497_v61 }
 0x104   :  { %v669_v57 = vadd.f32 %v653_v51, %v509_v44  ;;  %v654_v58 = vmul.f32 %v1019_v62, %v371_v52 }
 0x105   :  { %687 = vst [vmem:[%s1129_s5 + $0x30] sm:$0xff] %v671_v54  ;;  %v672_v63 = vadd.f32 %v656_v55, %v512_v49  ;;  %v787_v1 = vpop.f32.mrb[8].mxu1  ;;  %v647_v47 = vpop.permute.xlu1 %646 }
 0x106   :  { %685 = vst [vmem:[%s1129_s5 + $0x20] sm:$0xff] %v669_v57  ;;  %v670_v62 = vadd.f32 %v654_v58, %v510_v53  ;;  %v819_v0 = vpop.f32.mrb[8].mxu0  ;;  %v238_v3 = vpop.f32.mrb[9].mxu1 }
 0x107   :  { %688 = vst [vmem:[%s1129_s5 + $0x38] sm:$0xff] %v672_v63  ;;  %v392_v5 = vadd.f32 %v819_v0, %v787_v1  ;;  %v383_v7 = vpop.f32.mrb[9].mxu0  ;;  %v788_v8 = vpop.f32.mrb[10].mxu1 }
 0x108   :  { %686 = vst [vmem:[%s1129_s5 + $0x28] sm:$0xff] %v670_v62  ;;  %v384_v10 = vadd.f32 %v383_v7, %v238_v3  ;;  %v820_v12 = vpop.f32.mrb[10].mxu0  ;;  %v241_v13 = vpop.f32.mrb[11].mxu1 }
 0x109   :  { %v659_v14 = vmul.f32 %v622_v30, %v392_v5  ;;  %v395_v15 = vadd.f32 %v820_v12, %v788_v8  ;;  %v386_v17 = vpop.f32.mrb[11].mxu0 }
 0x10a   :  { %v657_v18 = vmul.f32 %v1024_v2, %v384_v10  ;;  %v387_v19 = vadd.f32 %v386_v17, %v241_v13  ;;  %v501_v2 = vld [vmem:[%s1128_s4 + $0x60] sm:$0xff] }
 0x10b   :  { %v675_v21 = vadd.f32 %v659_v14, %v515_v6  ;;  %v660_v22 = vmul.f32 %v627_v56, %v395_v15  ;;  %v517_v40 = vmul.f32 0.1, %v501_v2 }
 0x10c   :  { %v673_v24 = vadd.f32 %v657_v18, %v513_v11  ;;  %v658_v25 = vmul.f32 %v1035_v26, %v387_v19 }
 0x10d   :  { %691 = vst [vmem:[%s1129_s5 + $0x50] sm:$0xff] %v675_v21  ;;  %v676_v29 = vadd.f32 %v660_v22, %v516_v16  ;;  %v791_v30 = vpop.f32.mrb[12].mxu1 }
 0x10e   :  { %689 = vst [vmem:[%s1129_s5 + $0x40] sm:$0xff] %v673_v24  ;;  %v674_v26 = vadd.f32 %v658_v25, %v514_v20  ;;  %v823_v31 = vpop.f32.mrb[12].mxu0  ;;  %v254_v32 = vpop.f32.mrb[13].mxu1 }
 0x10f   :  { %692 = vst [vmem:[%s1129_s5 + $0x58] sm:$0xff] %v676_v29  ;;  %v408_v34 = vadd.f32 %v823_v31, %v791_v30  ;;  %v399_v36 = vpop.f32.mrb[13].mxu0  ;;  %v792_v37 = vpop.f32.mrb[14].mxu1 }
 0x110   :  { %690 = vst [vmem:[%s1129_s5 + $0x48] sm:$0xff] %v674_v26  ;;  %v400_v39 = vadd.f32 %v399_v36, %v254_v32  ;;  %v824_v41 = vpop.f32.mrb[14].mxu0  ;;  %v257_v42 = vpop.f32.mrb[15].mxu1 }
 0x111   :  { %v663_v43 = vmul.f32 %v642_v28, %v408_v34  ;;  %v411_v44 = vadd.f32 %v824_v41, %v792_v37  ;;  %v402_v46 = vpop.f32.mrb[15].mxu0 }
 0x112   :  { %v661_v48 = vmul.f32 %v632_v60, %v400_v39  ;;  %v403_v49 = vadd.f32 %v402_v46, %v257_v42 }
 0x113   :  { %v679_v51 = vadd.f32 %v663_v43, %v519_v35  ;;  %v664_v52 = vmul.f32 %v647_v47, %v411_v44 }
 0x114   :  { %v677_v53 = vadd.f32 %v661_v48, %v517_v40  ;;  %v662_v54 = vmul.f32 %v637_v23, %v403_v49 }
 0x115   :  { %695 = vst [vmem:[%s1129_s5 + $0x70] sm:$0xff] %v679_v51  ;;  %v680_v55 = vadd.f32 %v664_v52, %v520_v45 }
 0x116   :  { %693 = vst [vmem:[%s1129_s5 + $0x60] sm:$0xff] %v677_v53  ;;  %v678_v56 = vadd.f32 %v662_v54, %v518_v50 }
 0x117   :  { %696 = vst [vmem:[%s1129_s5 + $0x78] sm:$0xff] %v680_v55 }
 0x118   :  { %694 = vst [vmem:[%s1129_s5 + $0x68] sm:$0xff] %v678_v56 }

</bundles_post_ra>
